<compile_context>
chip_gen: v6e
topology: v6e:2x2x1
jax: 0.10.0
libtpu: 0.0.40
codegen_flags: <defaults>
</compile_context>

<pallas_src>
import functools

import jax
import jax.numpy as jnp
from jax.experimental import pallas as pl
from jax.experimental.pallas import tpu as pltpu


# ---------------------------------------------------------------------------
# Kernels
# ---------------------------------------------------------------------------

def _rms_rows(x, one_plus_gain, eps):
    """RMS-normalize each row (last axis), PyTorch-faithful dtype handling."""
    xf = x.astype(jnp.float32)
    rms = jnp.mean(xf * xf, axis=-1, keepdims=True)        # f32 mean of squares (XLU)
    norm = jax.lax.rsqrt(rms + eps).astype(x.dtype)        # .rsqrt().to(x.dtype) (EUP)
    # one_plus_gain is f32 (1, D): the final multiply promotes like PyTorch.
    return x * norm * one_plus_gain


def _qknorm_kernel(q_ref, k_ref, qg_ref, kg_ref, qo_ref, ko_ref, *, eps):
    # q_ref/k_ref: (TILE_ROWS, D); qg_ref/kg_ref: (1, D) = 1 + gain (f32).
    # NOTE: on a partial last block the padded rows flow through rsqrt (always
    # finite: mean>=0, +eps) and are dropped by the masked writeback -- this is
    # intentionally left unguarded (no data-dependent branch).
    qo_ref[...] = _rms_rows(q_ref[...], qg_ref[...], eps).astype(qo_ref.dtype)
    ko_ref[...] = _rms_rows(k_ref[...], kg_ref[...], eps).astype(ko_ref.dtype)


def _rmsnorm_kernel(x_ref, g_ref, o_ref, *, eps):
    o_ref[...] = _rms_rows(x_ref[...], g_ref[...], eps).astype(o_ref.dtype)


# ---------------------------------------------------------------------------
# Tiling helpers
# ---------------------------------------------------------------------------

_VMEM_RESIDENT_BUDGET = 24 << 20   # double-buffered stream budget (safe on v5e/v6e/v7x)
_VMEM_LIMIT_BYTES = 32 << 20       # explicit scoped-VMEM limit (< 64 MiB physical on v7x)
_MIN_STEP_BYTES = 4 << 20          # keep >= ~4 MiB HBM traffic per grid step
_TARGET_STEPS = 8                  # >= 3-4 steps per TensorCore on v7x (2 TCs)


def _round_up(x, m):
    return ((x + m - 1) // m) * m


def _sublane_multiple(dtype):
    itemsize = jnp.dtype(dtype).itemsize
    if itemsize >= 4:
        return 8
    if itemsize == 2:
        return 16
    return 32


def _pick_tile_rows(rows, mult, bytes_per_row, *, max_tile_rows,
                    vmem_budget=_VMEM_RESIDENT_BUDGET,
                    target_steps=_TARGET_STEPS,
                    min_step_bytes=_MIN_STEP_BYTES):
    """Pick a packing-aligned row tile that:
       (a) keeps the double-buffered resident set <= vmem_budget,
       (b) keeps each grid step moving >= min_step_bytes of HBM traffic,
       (c) yields >= target_steps grid steps when the problem is big enough."""
    rows_up = _round_up(rows, mult)
    cap = min(max_tile_rows, vmem_budget // (2 * bytes_per_row))
    cap = max(mult, (cap // mult) * mult)
    if rows_up <= cap and rows_up * bytes_per_row <= min_step_bytes:
        return rows_up                                   # tiny problem: one step
    min_tile = min(cap, max(mult, _round_up(pl.cdiv(min_step_bytes, bytes_per_row), mult)))
    tile = _round_up(pl.cdiv(rows, target_steps), mult)
    return max(min_tile, min(tile, cap))


def _resolve_out_dtype(x_dtype, gain_dtype, out_dtype):
    if out_dtype is None:
        # Fast path (default): output dtype == input dtype.  For bf16 inputs
        # this halves write traffic vs. PyTorch's f32 promotion; the math is
        # identical, only the final store cast differs.
        return jnp.dtype(x_dtype)
    if out_dtype == "promote":
        # Strict PyTorch parity: x * norm * (1 + gain) promotes to the wider
        # of x / gain dtypes (f32 output for bf16 inputs with an f32 gain).
        return jnp.result_type(x_dtype, gain_dtype)
    return jnp.dtype(out_dtype)


def _row_block_spec(tile, D, buffers):
    if buffers == 2:
        return pl.BlockSpec((tile, D), lambda i: (i, 0))
    # Optional deeper input pipelining; sweep before enabling (default off).
    return pl.BlockSpec((tile, D), lambda i: (i, 0), pipeline_mode=pl.Buffered(buffers))


# ---------------------------------------------------------------------------
# Wrappers
# ---------------------------------------------------------------------------

def rmsnorm_pallas(x, gain, *, eps=1e-6, max_tile_rows=4096, out_dtype=None,
                   input_buffers=2):
    """RMSNorm over the last axis of x: [B, H, S, D]; gain: [D]."""
    B, H, S, D = x.shape
    rows = B * H * S
    od = _resolve_out_dtype(x.dtype, gain.dtype, out_dtype)

    # Lane-density note: D is the lane axis; D % 128 == 0 keeps stores unmasked
    # and vregs full.  D = 64/80 still runs correctly, just lane-sparse.
    # TODO(synk): for D < 128 fold pairs of rows into one 128-lane row
    # (segmented in-kernel reduction) instead of running lane-sparse.

    x2 = x.reshape(rows, D)
    g2 = (1.0 + gain.astype(jnp.float32)).reshape(1, D)

    bytes_per_row = D * (jnp.dtype(x.dtype).itemsize + jnp.dtype(od).itemsize)
    mult = max(_sublane_multiple(x.dtype), _sublane_multiple(od))
    tile = _pick_tile_rows(rows, mult, bytes_per_row, max_tile_rows=max_tile_rows)
    grid = (pl.cdiv(rows, tile),)

    in_spec = _row_block_spec(tile, D, input_buffers)
    out_spec = pl.BlockSpec((tile, D), lambda i: (i, 0))
    gain_spec = pl.BlockSpec((1, D), lambda i: (0, 0))

    cost = pl.CostEstimate(flops=4 * rows * D, transcendentals=rows,
                           bytes_accessed=rows * bytes_per_row + 4 * D)

    out = pl.pallas_call(
        functools.partial(_rmsnorm_kernel, eps=eps),
        out_shape=jax.ShapeDtypeStruct((rows, D), od),
        grid_spec=pltpu.PrefetchScalarGridSpec(
            num_scalar_prefetch=0,
            grid=grid,
            in_specs=[in_spec, gain_spec],
            out_specs=out_spec),
        compiler_params=pltpu.CompilerParams(
            dimension_semantics=("parallel",),
            vmem_limit_bytes=_VMEM_LIMIT_BYTES),
        cost_estimate=cost,
    )(x2, g2)
    return out.reshape(B, H, S, D)


def qknorm_pallas(q, k, q_gain, k_gain, *, eps=1e-6, max_tile_rows=4096,
                  out_dtype=None, input_buffers=2, donate=False):
    """Fused QKNorm: one pallas_call normalizes a q tile and a k tile per step."""
    if q.shape != k.shape:
        # Cross-attention-style mismatched shapes: fall back to two launches.
        return (rmsnorm_pallas(q, q_gain, eps=eps, max_tile_rows=max_tile_rows,
                               out_dtype=out_dtype, input_buffers=input_buffers),
                rmsnorm_pallas(k, k_gain, eps=eps, max_tile_rows=max_tile_rows,
                               out_dtype=out_dtype, input_buffers=input_buffers))

    B, H, S, D = q.shape
    rows = B * H * S
    q_od = _resolve_out_dtype(q.dtype, q_gain.dtype, out_dtype)
    k_od = _resolve_out_dtype(k.dtype, k_gain.dtype, out_dtype)

    q2 = q.reshape(rows, D)
    k2 = k.reshape(rows, D)
    qg2 = (1.0 + q_gain.astype(jnp.float32)).reshape(1, D)
    kg2 = (1.0 + k_gain.astype(jnp.float32)).reshape(1, D)

    # 2 inputs + 2 outputs per row tile (double-buffered inside the budget).
    bytes_per_row = D * (jnp.dtype(q.dtype).itemsize + jnp.dtype(k.dtype).itemsize +
                         jnp.dtype(q_od).itemsize + jnp.dtype(k_od).itemsize)
    mult = max(_sublane_multiple(q.dtype), _sublane_multiple(k.dtype),
               _sublane_multiple(q_od), _sublane_multiple(k_od))
    tile = _pick_tile_rows(rows, mult, bytes_per_row, max_tile_rows=max_tile_rows)
    grid = (pl.cdiv(rows, tile),)

    in_row_spec = _row_block_spec(tile, D, input_buffers)
    out_row_spec = pl.BlockSpec((tile, D), lambda i: (i, 0))
    gain_spec = pl.BlockSpec((1, D), lambda i: (0, 0))

    cost = pl.CostEstimate(flops=8 * rows * D, transcendentals=2 * rows,
                           bytes_accessed=rows * bytes_per_row + 8 * D)

    aliases = {}
    if donate and q_od == q.dtype and k_od == k.dtype:
        aliases = {0: 0, 1: 1}   # q2 -> q_out, k2 -> k_out (callers must donate)

    q_out, k_out = pl.pallas_call(
        functools.partial(_qknorm_kernel, eps=eps),
        out_shape=(jax.ShapeDtypeStruct((rows, D), q_od),
                   jax.ShapeDtypeStruct((rows, D), k_od)),
        grid_spec=pltpu.PrefetchScalarGridSpec(
            num_scalar_prefetch=0,
            grid=grid,
            in_specs=[in_row_spec, in_row_spec, gain_spec, gain_spec],
            out_specs=(out_row_spec, out_row_spec)),
        compiler_params=pltpu.CompilerParams(
            dimension_semantics=("parallel",),
            vmem_limit_bytes=_VMEM_LIMIT_BYTES),
        cost_estimate=cost,
        input_output_aliases=aliases,
    )(q2, k2, qg2, kg2)
    return q_out.reshape(B, H, S, D), k_out.reshape(B, H, S, D)


# ---------------------------------------------------------------------------
# Pure-JAX reference (mirrors the PyTorch module exactly)
# ---------------------------------------------------------------------------

def qknorm_ref(q, k, q_gain, k_gain, eps=1e-6):
    def rms(x, g):
        xf = x.astype(jnp.float32)
        r = jnp.mean(xf * xf, axis=-1, keepdims=True)
        n = jax.lax.rsqrt(r + eps).astype(x.dtype)
        return x * n * (1.0 + g[None, None, None, :].astype(jnp.float32))
    return rms(q, q_gain), rms(k, k_gain)


if __name__ == "__main__":
    key = jax.random.PRNGKey(0)
    kq, kk, kgq, kgk = jax.random.split(key, 4)

    # --- test 1: f32, small self-attention-like shape ----------------------
    B, H, S, D = 2, 4, 8, 128
    q = jax.random.normal(kq, (B, H, S, D), dtype=jnp.float32)
    k = jax.random.normal(kk, (B, H, S, D), dtype=jnp.float32)
    # Deterministic parameter init: torch.randn(dim) * 0.02
    q_gain = jax.random.normal(kgq, (D,), dtype=jnp.float32) * 0.02
    k_gain = jax.random.normal(kgk, (D,), dtype=jnp.float32) * 0.02

    q_out, k_out = qknorm_pallas(q, k, q_gain, k_gain)
    jax.block_until_ready((q_out, k_out))
    q_exp, k_exp = qknorm_ref(q, k, q_gain, k_gain)
    assert q_out.dtype == q_exp.dtype and k_out.dtype == k_exp.dtype
    assert jnp.allclose(q_out, q_exp, atol=1e-5, rtol=1e-5)
    assert jnp.allclose(k_out, k_exp, atol=1e-5, rtol=1e-5)

    # --- test 2: non-divisible row count (cdiv grid + masked writeback) ----
    q_b = jax.random.normal(kq, (1, 3, 7, D), dtype=jnp.float32)   # 21 rows
    k_b = jax.random.normal(kk, (1, 3, 7, D), dtype=jnp.float32)
    q_out2, k_out2 = qknorm_pallas(q_b, k_b, q_gain, k_gain)
    jax.block_until_ready((q_out2, k_out2))
    q_exp2, k_exp2 = qknorm_ref(q_b, k_b, q_gain, k_gain)
    assert jnp.allclose(q_out2, q_exp2, atol=1e-5, rtol=1e-5)
    assert jnp.allclose(k_out2, k_exp2, atol=1e-5, rtol=1e-5)

    # --- test 3: bf16 inputs -- fast path (bf16 out) and strict parity ------
    q_h = q.astype(jnp.bfloat16)
    k_h = k.astype(jnp.bfloat16)
    q_exp3, k_exp3 = qknorm_ref(q_h, k_h, q_gain, k_gain)          # f32 (torch promotion)

    q_out3, k_out3 = qknorm_pallas(q_h, k_h, q_gain, k_gain)       # default: bf16 out
    jax.block_until_ready((q_out3, k_out3))
    assert q_out3.dtype == jnp.bfloat16 and k_out3.dtype == jnp.bfloat16
    assert jnp.allclose(q_out3.astype(jnp.float32), q_exp3, atol=2e-2, rtol=2e-2)
    assert jnp.allclose(k_out3.astype(jnp.float32), k_exp3, atol=2e-2, rtol=2e-2)

    q_out3p, k_out3p = qknorm_pallas(q_h, k_h, q_gain, k_gain, out_dtype="promote")
    jax.block_until_ready((q_out3p, k_out3p))
    assert q_out3p.dtype == jnp.float32                            # torch-faithful
    assert jnp.allclose(q_out3p, q_exp3, atol=1e-2, rtol=1e-2)
    assert jnp.allclose(k_out3p, k_exp3, atol=1e-2, rtol=1e-2)

    # --- test 4: multi-step grid (exercises pipeline + tile heuristic) ------
    S4 = 1024                                                      # rows = 8192 -> grid 4
    q4 = jax.random.normal(kq, (2, 4, S4, D), dtype=jnp.float32)
    k4 = jax.random.normal(kk, (2, 4, S4, D), dtype=jnp.float32)
    q_out4, k_out4 = qknorm_pallas(q4, k4, q_gain, k_gain)
    jax.block_until_ready((q_out4, k_out4))
    q_exp4, k_exp4 = qknorm_ref(q4, k4, q_gain, k_gain)
    assert jnp.allclose(q_out4, q_exp4, atol=1e-5, rtol=1e-5)
    assert jnp.allclose(k_out4, k_exp4, atol=1e-5, rtol=1e-5)

    print("KERNEL_OK")
</pallas_src>

<mosaic_0001>
module attributes {stable_mosaic.version = 11 : i64} {
  func.func @_qknorm_kernel(%arg0: i32, %arg1: memref<64x128xf32, #tpu.memory_space<vmem>>, %arg2: memref<64x128xf32, #tpu.memory_space<vmem>>, %arg3: memref<1x128xf32, #tpu.memory_space<vmem>>, %arg4: memref<1x128xf32, #tpu.memory_space<vmem>>, %arg5: memref<64x128xf32, #tpu.memory_space<vmem>>, %arg6: memref<64x128xf32, #tpu.memory_space<vmem>>) attributes {dimension_semantics = [#tpu.dimension_semantics<parallel>], iteration_bounds = array<i64: 1>, scalar_prefetch = 0 : i64, scratch_operands = 0 : i64, tpu.core_type = #tpu.core_type<tc>, window_params = [{transform_indices = @transform_0, window_bounds = array<i64: 64, 128>}, {transform_indices = @transform_1, window_bounds = array<i64: 64, 128>}, {pipeline_mode = #tpu.pipeline_mode<synchronous>, transform_indices = @transform_2, window_bounds = array<i64: 1, 128>}, {pipeline_mode = #tpu.pipeline_mode<synchronous>, transform_indices = @transform_3, window_bounds = array<i64: 1, 128>}, {transform_indices = @transform_4, window_bounds = array<i64: 64, 128>}, {transform_indices = @transform_5, window_bounds = array<i64: 64, 128>}]} {
    %c0 = arith.constant 0 : index
    %c0_0 = arith.constant 0 : index
    %0 = vector.load %arg1[%c0, %c0_0] : memref<64x128xf32, #tpu.memory_space<vmem>>, vector<64x128xf32>
    %c0_1 = arith.constant 0 : index
    %c0_2 = arith.constant 0 : index
    %1 = vector.load %arg3[%c0_1, %c0_2] : memref<1x128xf32, #tpu.memory_space<vmem>>, vector<1x128xf32>
    %2 = arith.mulf %0, %0 : vector<64x128xf32>
    %cst = arith.constant dense<0.000000e+00> : vector<64xf32>
    %3 = vector.multi_reduction <add>, %2, %cst [1] : vector<64x128xf32> to vector<64xf32>
    %4 = vector.shape_cast %3 : vector<64xf32> to vector<64x1xf32>
    %cst_3 = arith.constant 1.280000e+02 : f32
    %5 = vector.broadcast %cst_3 : f32 to vector<64x1xf32>
    %6 = arith.divf %4, %5 : vector<64x1xf32>
    %cst_4 = arith.constant 9.99999997E-7 : f32
    %7 = vector.broadcast %cst_4 : f32 to vector<64x1xf32>
    %8 = arith.addf %6, %7 : vector<64x1xf32>
    %9 = math.rsqrt %8 : vector<64x1xf32>
    %10 = vector.broadcast %9 : vector<64x1xf32> to vector<64x128xf32>
    %11 = arith.mulf %0, %10 : vector<64x128xf32>
    %12 = vector.broadcast %1 : vector<1x128xf32> to vector<64x128xf32>
    %13 = arith.mulf %11, %12 : vector<64x128xf32>
    %c0_5 = arith.constant 0 : index
    %c0_6 = arith.constant 0 : index
    %14 = vector.load %arg5[%c0_5, %c0_6] : memref<64x128xf32, #tpu.memory_space<vmem>>, vector<64x128xf32>
    tpu.vector_store %arg5[%c0_5, %c0_6], %13 {strides = array<i32>} : memref<64x128xf32, #tpu.memory_space<vmem>>, vector<64x128xf32>,
    %c0_7 = arith.constant 0 : index
    %c0_8 = arith.constant 0 : index
    %15 = vector.load %arg2[%c0_7, %c0_8] : memref<64x128xf32, #tpu.memory_space<vmem>>, vector<64x128xf32>
    %c0_9 = arith.constant 0 : index
    %c0_10 = arith.constant 0 : index
    %16 = vector.load %arg4[%c0_9, %c0_10] : memref<1x128xf32, #tpu.memory_space<vmem>>, vector<1x128xf32>
    %17 = arith.mulf %15, %15 : vector<64x128xf32>
    %cst_11 = arith.constant dense<0.000000e+00> : vector<64xf32>
    %18 = vector.multi_reduction <add>, %17, %cst_11 [1] : vector<64x128xf32> to vector<64xf32>
    %19 = vector.shape_cast %18 : vector<64xf32> to vector<64x1xf32>
    %cst_12 = arith.constant 1.280000e+02 : f32
    %20 = vector.broadcast %cst_12 : f32 to vector<64x1xf32>
    %21 = arith.divf %19, %20 : vector<64x1xf32>
    %cst_13 = arith.constant 9.99999997E-7 : f32
    %22 = vector.broadcast %cst_13 : f32 to vector<64x1xf32>
    %23 = arith.addf %21, %22 : vector<64x1xf32>
    %24 = math.rsqrt %23 : vector<64x1xf32>
    %25 = vector.broadcast %24 : vector<64x1xf32> to vector<64x128xf32>
    %26 = arith.mulf %15, %25 : vector<64x128xf32>
    %27 = vector.broadcast %16 : vector<1x128xf32> to vector<64x128xf32>
    %28 = arith.mulf %26, %27 : vector<64x128xf32>
    %c0_14 = arith.constant 0 : index
    %c0_15 = arith.constant 0 : index
    %29 = vector.load %arg6[%c0_14, %c0_15] : memref<64x128xf32, #tpu.memory_space<vmem>>, vector<64x128xf32>
    tpu.vector_store %arg6[%c0_14, %c0_15], %28 {strides = array<i32>} : memref<64x128xf32, #tpu.memory_space<vmem>>, vector<64x128xf32>,
    return
  }
  func.func @transform_0(%arg0: i32) -> (i32, i32) {
    %c0_i32 = arith.constant 0 : i32
    %c0_i32_0 = arith.constant 0 : i32
    return %arg0, %c0_i32 : i32, i32
  }
  func.func @transform_1(%arg0: i32) -> (i32, i32) {
    %c0_i32 = arith.constant 0 : i32
    %c0_i32_0 = arith.constant 0 : i32
    return %arg0, %c0_i32 : i32, i32
  }
  func.func @transform_2(%arg0: i32) -> (i32, i32) {
    %c0_i32 = arith.constant 0 : i32
    %c0_i32_0 = arith.constant 0 : i32
    %c0_i32_1 = arith.constant 0 : i32
    return %c0_i32, %c0_i32_0 : i32, i32
  }
  func.func @transform_3(%arg0: i32) -> (i32, i32) {
    %c0_i32 = arith.constant 0 : i32
    %c0_i32_0 = arith.constant 0 : i32
    %c0_i32_1 = arith.constant 0 : i32
    return %c0_i32, %c0_i32_0 : i32, i32
  }
  func.func @transform_4(%arg0: i32) -> (i32, i32) {
    %c0_i32 = arith.constant 0 : i32
    %c0_i32_0 = arith.constant 0 : i32
    return %arg0, %c0_i32 : i32, i32
  }
  func.func @transform_5(%arg0: i32) -> (i32, i32) {
    %c0_i32 = arith.constant 0 : i32
    %c0_i32_0 = arith.constant 0 : i32
    return %arg0, %c0_i32 : i32, i32
  }
}

</mosaic_0001>

<bundles_post_ra>
// kernel: tpu_custom_call.1
= control target key start
LH: loop header
LB: loop body
LE: loop exit
PB: predicated region body
PF: predicated region fallthrough
CT: control target
= control target key end

     0   :  { %11 = vsyncpa [#allocation3], 0  ;;  %s532_s0 = inlined_call_operand.hbm [shape: f32[64,128], index: 0, kind: input, shape index: {}]   ;;  %s533_s1 = inlined_call_operand.hbm [shape: f32[64,128], index: 1, kind: input, shape index: {}]   ;;  %s534_s2 = inlined_call_operand.vmem [shape: f32[1,128], index: 2, kind: input, shape index: {}]   ;;  %s535_s3 = inlined_call_operand.vmem [shape: f32[1,128], index: 3, kind: input, shape index: {}]   ;;  %s536_s4 = inlined_call_operand.hbm [shape: f32[64,128], index: 4, kind: output, shape index: {0}]   ;;  %s537_s5 = inlined_call_operand.hbm [shape: f32[64,128], index: 5, kind: output, shape index: {1}]  }
   0x1   :  { %12 = vsyncpa [#allocation6], 0 }
   0x2   :  { %13 = vsyncpa [#allocation4], 0 }
   0x3   :  { %14 = vsyncpa [#allocation9], 0  ;;  %s386_s18 = smov [#allocation2]  }
   0x4   :  { %s20_s19 = sshll.u32 %s386_s18, 4  ;;  %s21_s19 = int_to_ptr.vmem [resolvable:$true] %s20_s19 }
   0x5   :  { %s306_s20 = scalar_lea.vmem %s21_s19, 1024  ;;  %p311_p1 = scmp.lt.s32.totalorder %s21_s19, %s21_s19 }
   0x6   :  { %p307_p0 = scmp.ne.s32.totalorder %s21_s19, %s306_s20  ;;  %p312_p2 = scmp.lt.s32.totalorder %s306_s20, %s306_s20 }
   0x8   :  { %p313_p3 = por %p312_p2, %p311_p1 }
   0xa   :  { %p314_p4 = pnand %p313_p3, %p307_p0 }
   0xc   :  { %317 = shalt.err (!%p314_p4)
}
   0xd   :  { %s387_s21 = smov 128   ;;  %s388_s22 = smov 8  }
   0xe   :  { %26 = dma.hbm_to_vmem [thread:$0]  %s532_s0, 1024, %s21_s19, [#allocation3], %s387_s21, %s387_s21, %s388_s22  }
   0xf   :  { %s389_s25 = smov [#allocation5]  }
  0x10   :  { %s32_s26 = sshll.u32 %s389_s25, 4  ;;  %s33_s26 = int_to_ptr.vmem [resolvable:$true] %s32_s26 }
  0x11   :  { %s326_s27 = scalar_lea.vmem %s33_s26, 1024  ;;  %p331_p6 = scmp.lt.s32.totalorder %s33_s26, %s33_s26 }
  0x12   :  { %p327_p5 = scmp.ne.s32.totalorder %s33_s26, %s326_s27  ;;  %p332_p7 = scmp.lt.s32.totalorder %s326_s27, %s326_s27 }
  0x14   :  { %p333_p8 = por %p332_p7, %p331_p6 }
  0x16   :  { %p334_p9 = pnand %p333_p8, %p327_p5 }
  0x18   :  { %337 = shalt.err (!%p334_p9)
}
  0x19   :  { %38 = dma.hbm_to_vmem [thread:$0]  %s533_s1, 1024, %s33_s26, [#allocation6], %s387_s21, %s387_s21, %s388_s22  }
  0x1a   :  { %378 = dma.done.wait [#allocation3], 1024  }
  0x1b   :  { %379 = vsyncadd [#allocation3], 4294966272 }
  0x1c   :  { %380 = dma.done.wait [#allocation6], 1024  }
  0x1d   :  { %381 = vsyncadd [#allocation6], 4294966272  ;;  %v434_v0 = vld [vmem:[#allocation2 + $0x10] sm:$0xff]  ;;  %v436_v1 = vld [vmem:[#allocation2] sm:$0xff] }
  0x1e   :  { %v438_v2 = vld [vmem:[#allocation2 + $0x18] sm:$0xff]  ;;  %v60_v3 = vmul.f32 %v434_v0, %v434_v0  ;;  %v58_v4 = vmul.f32 %v436_v1, %v436_v1  ;;  %v444_v5 = vld [vmem:[#allocation2 + $0x8] sm:$0xff]  ;;  %v452_v9 = vld [vmem:[#allocation2 + $0x20] sm:$0xff] }
  0x1f   :  { %v61_v6 = vmul.f32 %v438_v2, %v438_v2  ;;  %v59_v7 = vmul.f32 %v444_v5, %v444_v5  ;;  %v450_v8 = vld [vmem:[#allocation2 + $0x28] sm:$0xff]  ;;  %v62_v11 = vmul.f32 %v452_v9, %v452_v9  ;;  %v458_v12 = vld [vmem:[#allocation2 + $0x38] sm:$0xff]  ;;  %v460_v13 = vld [vmem:[#allocation2 + $0x30] sm:$0xff] }
  0x20   :  { %70 = vadd.xlane.f32.xlu1 %v60_v3  ;;  %66 = vadd.xlane.f32.xlu0 %v58_v4  ;;  %v63_v10 = vmul.f32 %v450_v8, %v450_v8  ;;  %v65_v14 = vmul.f32 %v458_v12, %v458_v12  ;;  %v64_v15 = vmul.f32 %v460_v13, %v460_v13  ;;  %v466_v16 = vld [vmem:[#allocation5 + $0x8] sm:$0xff]  ;;  %v468_v17 = vld [vmem:[#allocation5] sm:$0xff]  ;;  %v474_v20 = vld [vmem:[#allocation5 + $0x18] sm:$0xff] }
  0x21   :  { %v147_v18 = vmul.f32 %v466_v16, %v466_v16  ;;  %v146_v19 = vmul.f32 %v468_v17, %v468_v17  ;;  %v476_v21 = vld [vmem:[#allocation5 + $0x10] sm:$0xff]  ;;  %v149_v22 = vmul.f32 %v474_v20, %v474_v20  ;;  %v482_v24 = vld [vmem:[#allocation5 + $0x28] sm:$0xff]  ;;  %v484_v25 = vld [vmem:[#allocation5 + $0x20] sm:$0xff] }
  0x22   :  { %v148_v23 = vmul.f32 %v476_v21, %v476_v21  ;;  %v151_v26 = vmul.f32 %v482_v24, %v482_v24  ;;  %v150_v27 = vmul.f32 %v484_v25, %v484_v25  ;;  %v490_v28 = vld [vmem:[#allocation5 + $0x38] sm:$0xff]  ;;  %v492_v29 = vld [vmem:[#allocation5 + $0x30] sm:$0xff]  ;;  %v258_v61 = vld [vmem:[%s534_s2] ss:$0 sm:$0xff]  ;;  %s390_s2 = smov [#allocation7]  }
  0x23   :  { %v153_v30 = vmul.f32 %v490_v28, %v490_v28  ;;  %v152_v31 = vmul.f32 %v492_v29, %v492_v29  ;;  %s229_s30 = sshll.u32 %s390_s2, 4  ;;  %s230_s30 = int_to_ptr.vmem [resolvable:$true] %s229_s30 }
  0x24   :  { %72 = vadd.xlane.f32.xlu1 %v61_v6  ;;  %68 = vadd.xlane.f32.xlu0 %v59_v7  ;;  %s338_s8 = scalar_lea.vmem %s230_s30, 1024  ;;  %p343_p11 = scmp.lt.s32.totalorder %s230_s30, %s230_s30 }
  0x25   :  { %p339_p10 = scmp.ne.s32.totalorder %s230_s30, %s338_s8  ;;  %p344_p12 = scmp.lt.s32.totalorder %s338_s8, %s338_s8 }
  0x27   :  { %p345_p13 = por %p344_p12, %p343_p11 }
  0x28   :  { %76 = vadd.xlane.f32.xlu1 %v63_v10  ;;  %74 = vadd.xlane.f32.xlu0 %v62_v11 }
  0x29   :  { %p346_p0 = pnand %p345_p13, %p339_p10 }
  0x2c   :  { %80 = vadd.xlane.f32.xlu1 %v65_v14  ;;  %78 = vadd.xlane.f32.xlu0 %v64_v15 }
  0x30   :  { %156 = vadd.xlane.f32.xlu1 %v147_v18  ;;  %154 = vadd.xlane.f32.xlu0 %v146_v19 }
  0x34   :  { %160 = vadd.xlane.f32.xlu1 %v149_v22  ;;  %158 = vadd.xlane.f32.xlu0 %v148_v23 }
  0x38   :  { %164 = vadd.xlane.f32.xlu1 %v151_v26  ;;  %162 = vadd.xlane.f32.xlu0 %v150_v27 }
  0x3c   :  { %168 = vadd.xlane.f32.xlu1 %v153_v30  ;;  %166 = vadd.xlane.f32.xlu0 %v152_v31 }
  0xa9   :  { %v71_v32 = vpop.xlane.xlu1 %70  ;;  %v67_v33 = vpop.xlane.xlu0 %66 }
  0xaa   :  { %v85_v34 = vmul.f32 0.0078125, %v71_v32  ;;  %v83_v35 = vmul.f32 0.0078125, %v67_v33 }
  0xac   :  { %v93_v36 = vadd.f32 1e-06, %v85_v34  ;;  %v91_v37 = vadd.f32 1e-06, %v83_v35 }
  0xad   :  { %v73_v38 = vpop.xlane.xlu1 %72  ;;  %v69_v39 = vpop.xlane.xlu0 %68 }
  0xae   :  { %266 = vrsqrt.f32 %v93_v36  ;;  %v86_v40 = vmul.f32 0.0078125, %v73_v38  ;;  %v84_v41 = vmul.f32 0.0078125, %v69_v39 }
  0xaf   :  { %268 = vrsqrt.f32 %v91_v37 }
  0xb0   :  { %v94_v42 = vadd.f32 1e-06, %v86_v40  ;;  %v92_v43 = vadd.f32 1e-06, %v84_v41 }
  0xb1   :  { %v77_v44 = vpop.xlane.xlu1 %76  ;;  %v75_v45 = vpop.xlane.xlu0 %74 }
  0xb2   :  { %270 = vrsqrt.f32 %v94_v42  ;;  %v88_v46 = vmul.f32 0.0078125, %v77_v44  ;;  %v87_v47 = vmul.f32 0.0078125, %v75_v45 }
  0xb3   :  { %272 = vrsqrt.f32 %v92_v43 }
  0xb4   :  { %v96_v48 = vadd.f32 1e-06, %v88_v46  ;;  %v95_v49 = vadd.f32 1e-06, %v87_v47 }
  0xb5   :  { %v81_v50 = vpop.xlane.xlu1 %80  ;;  %v79_v51 = vpop.xlane.xlu0 %78 }
  0xb6   :  { %274 = vrsqrt.f32 %v96_v48  ;;  %v90_v52 = vmul.f32 0.0078125, %v81_v50  ;;  %v89_v53 = vmul.f32 0.0078125, %v79_v51 }
  0xb7   :  { %276 = vrsqrt.f32 %v95_v49 }
  0xb8   :  { %v98_v54 = vadd.f32 1e-06, %v90_v52  ;;  %v97_v55 = vadd.f32 1e-06, %v89_v53  ;;  %v259_v52 = vld [vmem:[%s535_s3] ss:$0 sm:$0xff] }
  0xb9   :  { %v157_v56 = vpop.xlane.xlu1 %156  ;;  %v155_v57 = vpop.xlane.xlu0 %154 }
  0xba   :  { %278 = vrsqrt.f32 %v98_v54  ;;  %v171_v58 = vmul.f32 0.0078125, %v157_v56  ;;  %v170_v59 = vmul.f32 0.0078125, %v155_v57 }
  0xbb   :  { %v267_v60 = vpop.eup %266  ;;  %280 = vrsqrt.f32 %v97_v55 }
  0xbc   :  { %v269_v62 = vpop.eup %268  ;;  %v109_v63 = vmul.f32 %v267_v60, %v434_v0  ;;  %v179_v3 = vadd.f32 1e-06, %v171_v58  ;;  %v178_v4 = vadd.f32 1e-06, %v170_v59 }
  0xbd   :  { %v107_v6 = vmul.f32 %v269_v62, %v436_v1  ;;  %v161_v7 = vpop.xlane.xlu1 %160  ;;  %v159_v10 = vpop.xlane.xlu0 %158 }
  0xbe   :  { %v123_v11 = vmul.f32 %v258_v61, %v109_v63  ;;  %282 = vrsqrt.f32 %v179_v3  ;;  %v173_v14 = vmul.f32 0.0078125, %v161_v7  ;;  %v172_v15 = vmul.f32 0.0078125, %v159_v10 }
  0xbf   :  { %v271_v18 = vpop.eup %270  ;;  %v121_v19 = vmul.f32 %v258_v61, %v107_v6  ;;  %284 = vrsqrt.f32 %v178_v4 }
  0xc0   :  { %v273_v22 = vpop.eup %272  ;;  %131 = vst [vmem:[#allocation7 + $0x10] sm:$0xff] %v123_v11  ;;  %v110_v23 = vmul.f32 %v271_v18, %v438_v2  ;;  %v181_v26 = vadd.f32 1e-06, %v173_v14  ;;  %v180_v27 = vadd.f32 1e-06, %v172_v15 }
  0xc1   :  { %129 = vst [vmem:[#allocation7] sm:$0xff] %v121_v19  ;;  %v108_v0 = vmul.f32 %v273_v22, %v444_v5  ;;  %v165_v30 = vpop.xlane.xlu1 %164  ;;  %v163_v1 = vpop.xlane.xlu0 %162 }
  0xc2   :  { %v124_v31 = vmul.f32 %v258_v61, %v110_v23  ;;  %286 = vrsqrt.f32 %v181_v26  ;;  %v175_v32 = vmul.f32 0.0078125, %v165_v30  ;;  %v174_v33 = vmul.f32 0.0078125, %v163_v1 }
  0xc3   :  { %v275_v34 = vpop.eup %274  ;;  %v122_v35 = vmul.f32 %v258_v61, %v108_v0  ;;  %288 = vrsqrt.f32 %v180_v27 }
  0xc4   :  { %v277_v36 = vpop.eup %276  ;;  %132 = vst [vmem:[#allocation7 + $0x18] sm:$0xff] %v124_v31  ;;  %v112_v37 = vmul.f32 %v275_v34, %v450_v8  ;;  %v183_v38 = vadd.f32 1e-06, %v175_v32  ;;  %v182_v2 = vadd.f32 1e-06, %v174_v33 }
  0xc5   :  { %130 = vst [vmem:[#allocation7 + $0x8] sm:$0xff] %v122_v35  ;;  %v111_v39 = vmul.f32 %v277_v36, %v452_v9  ;;  %v169_v40 = vpop.xlane.xlu1 %168  ;;  %v167_v5 = vpop.xlane.xlu0 %166 }
  0xc6   :  { %v126_v41 = vmul.f32 %v258_v61, %v112_v37  ;;  %290 = vrsqrt.f32 %v183_v38  ;;  %v177_v42 = vmul.f32 0.0078125, %v169_v40  ;;  %v176_v43 = vmul.f32 0.0078125, %v167_v5 }
  0xc7   :  { %v279_v44 = vpop.eup %278  ;;  %v125_v45 = vmul.f32 %v258_v61, %v111_v39  ;;  %292 = vrsqrt.f32 %v182_v2 }
  0xc8   :  { %v281_v46 = vpop.eup %280  ;;  %134 = vst [vmem:[#allocation7 + $0x28] sm:$0xff] %v126_v41  ;;  %v114_v47 = vmul.f32 %v279_v44, %v458_v12  ;;  %v185_v48 = vadd.f32 1e-06, %v177_v42  ;;  %v184_v8 = vadd.f32 1e-06, %v176_v43 }
  0xc9   :  { %133 = vst [vmem:[#allocation7 + $0x20] sm:$0xff] %v125_v45  ;;  %v113_v9 = vmul.f32 %v281_v46, %v460_v13 }
  0xca   :  { %v128_v49 = vmul.f32 %v258_v61, %v114_v47  ;;  %294 = vrsqrt.f32 %v185_v48 }
  0xcb   :  { %v283_v50 = vpop.eup %282  ;;  %v127_v51 = vmul.f32 %v258_v61, %v113_v9  ;;  %296 = vrsqrt.f32 %v184_v8 }
  0xcc   :  { %v285_v53 = vpop.eup %284  ;;  %136 = vst [vmem:[#allocation7 + $0x38] sm:$0xff] %v128_v49  ;;  %v195_v12 = vmul.f32 %v283_v50, %v466_v16 }
  0xcd   :  { %135 = vst [vmem:[#allocation7 + $0x30] sm:$0xff] %v127_v51  ;;  %v194_v54 = vmul.f32 %v285_v53, %v468_v17 }
  0xce   :  { %v209_v55 = vmul.f32 %v259_v52, %v195_v12 }
  0xcf   :  { %349 = shalt.err (!%p346_p0)
}
  0xd0   :  { %235 = dma.vmem_to_hbm [thread:$0]  %s230_s30, 1024, %s536_s4, [#allocation4], %s387_s21, %s387_s21, %s388_s22   ;;  %v287_v13 = vpop.eup %286  ;;  %v208_v16 = vmul.f32 %v259_v52, %v194_v54  ;;  %217 = vst [vmem:[#allocation8 + $0x8] sm:$0xff] %v209_v55 }
  0xd1   :  { %v289_v56 = vpop.eup %288  ;;  %v197_v17 = vmul.f32 %v287_v13, %v474_v20  ;;  %s391_s4 = smov [#allocation8]  }
  0xd2   :  { %216 = vst [vmem:[#allocation8] sm:$0xff] %v208_v16  ;;  %v196_v57 = vmul.f32 %v289_v56, %v476_v21  ;;  %s241_s10 = sshll.u32 %s391_s4, 4  ;;  %s242_s10 = int_to_ptr.vmem [resolvable:$true] %s241_s10 }
  0xd3   :  { %v211_v58 = vmul.f32 %v259_v52, %v197_v17  ;;  %v291_v59 = vpop.eup %290  ;;  %s358_s11 = scalar_lea.vmem %s242_s10, 1024  ;;  %p363_p2 = scmp.lt.s32.totalorder %s242_s10, %s242_s10 }
  0xd4   :  { %v210_v60 = vmul.f32 %v259_v52, %v196_v57  ;;  %v293_v61 = vpop.eup %292  ;;  %v199_v62 = vmul.f32 %v291_v59, %v482_v24  ;;  %p359_p1 = scmp.ne.s32.totalorder %s242_s10, %s358_s11  ;;  %p364_p3 = scmp.lt.s32.totalorder %s358_s11, %s358_s11 }
  0xd5   :  { %219 = vst [vmem:[#allocation8 + $0x18] sm:$0xff] %v211_v58  ;;  %v198_v63 = vmul.f32 %v293_v61, %v484_v25 }
  0xd6   :  { %218 = vst [vmem:[#allocation8 + $0x10] sm:$0xff] %v210_v60  ;;  %v213_v3 = vmul.f32 %v259_v52, %v199_v62  ;;  %p365_p4 = por %p364_p3, %p363_p2 }
  0xd7   :  { %v295_v4 = vpop.eup %294  ;;  %v212_v6 = vmul.f32 %v259_v52, %v198_v63 }
  0xd8   :  { %v297_v7 = vpop.eup %296  ;;  %221 = vst [vmem:[#allocation8 + $0x28] sm:$0xff] %v213_v3  ;;  %v201_v20 = vmul.f32 %v295_v4, %v490_v28  ;;  %p366_p5 = pnand %p365_p4, %p359_p1 }
  0xd9   :  { %220 = vst [vmem:[#allocation8 + $0x20] sm:$0xff] %v212_v6  ;;  %v200_v21 = vmul.f32 %v297_v7, %v492_v29 }
  0xda   :  { %v215_v10 = vmul.f32 %v259_v52, %v201_v20 }
  0xdb   :  { %v214_v11 = vmul.f32 %v259_v52, %v200_v21 }
  0xdc   :  { %223 = vst [vmem:[#allocation8 + $0x38] sm:$0xff] %v215_v10 }
  0xdd   :  { %222 = vst [vmem:[#allocation8 + $0x30] sm:$0xff] %v214_v11 }
  0xde   :  { %369 = shalt.err (!%p366_p5)
}
  0xdf   :  { %247 = dma.vmem_to_hbm [thread:$0]  %s242_s10, 1024, %s537_s5, [#allocation9], %s387_s21, %s387_s21, %s388_s22  }
  0xe0   :  { %382 = dma.done.wait [#allocation4], 1024  }
  0xe1   :  { %383 = vsyncadd [#allocation4], 4294966272 }
  0xe2   :  { %384 = dma.done.wait [#allocation9], 1024  }
  0xe3   :  { %385 = vsyncadd [#allocation9], 4294966272 }
  0xe4   :  { %254 = vsyncpa [#allocation3], 1 }
  0xe5   :  { %255 = vsyncpa [#allocation6], 1 }
  0xe6   :  { %256 = vsyncpa [#allocation4], 1 }
  0xe7   :  { %257 = vsyncpa [#allocation9], 1 }

</bundles_post_ra>
